<compile_context>
chip_gen: v6e
topology: v6e:2x2x1
jax: 0.10.0
libtpu: 0.0.40
codegen_flags: <defaults>
</compile_context>

<pallas_src>
import functools
import itertools

import jax
import jax.numpy as jnp
from jax.experimental import pallas as pl
from jax.experimental.pallas import tpu as pltpu

NEG_SLOPE = 0.01   # nn.LeakyReLU() default
BN_EPS = 1e-5      # nn.BatchNorm3d default


def _lrelu(v):
    return jnp.where(v >= 0, v, NEG_SLOPE * v)


# ----------------------------- Pallas kernels ------------------------------

def _bn_stats_kernel(x_ref, g_ref, b_ref, scale_ref, shift_ref):
    # x: (C, N*D*H*W), channels on sublanes / spatial on lanes.
    # Emits the fused training-mode BatchNorm affine: y = x * scale + shift.
    x = x_ref[...]
    n = x.shape[1]
    mean = jnp.sum(x, axis=1, keepdims=True) / n
    xc = x - mean
    var = jnp.sum(xc * xc, axis=1, keepdims=True) / n
    inv = jax.lax.rsqrt(var + BN_EPS)
    scale = g_ref[...] * inv
    scale_ref[...] = scale.astype(scale_ref.dtype)
    shift_ref[...] = (b_ref[...] - mean * scale).astype(shift_ref.dtype)


def _dense_block_kernel(x_ref, scale_ref, shift_ref,
                        w1_ref, b1_ref, w2_ref, b2_ref, w3_ref, b3_ref,
                        w4_ref, b4_ref, w5_ref, b5_ref, o_ref, *, D, H, W):
    Mp = D * H * W

    # BatchNorm applied as a per-channel affine (stats precomputed over the batch).
    a0 = x_ref[0] * scale_ref[...] + shift_ref[...]            # (Cin, Mp)

    # Static flat shifts + validity masks for the 27 taps of a 3x3x3 SAME conv.
    m_idx = jax.lax.broadcasted_iota(jnp.int32, (1, Mp), 1)
    d_idx = m_idx // (H * W)
    h_idx = (m_idx // W) % H
    w_idx = m_idx % W
    shifts, masks = [], []
    for kd, kh, kw in itertools.product(range(3), repeat=3):
        dd, dh, dw = kd - 1, kh - 1, kw - 1
        shifts.append(dd * H * W + dh * W + dw)
        masks.append((d_idx + dd >= 0) & (d_idx + dd < D) &
                     (h_idx + dh >= 0) & (h_idx + dh < H) &
                     (w_idx + dw >= 0) & (w_idx + dw < W))

    def conv(act, w_ref, b_ref):
        # In-VMEM im2col: lane-roll + mask each tap (any lane-wrapped position is
        # always masked), stack taps on sublanes, one MXU matmul with the spatial
        # axis lane-dense on the output, fused bias + LeakyReLU epilogue.
        taps = []
        for t in range(27):
            v = act if shifts[t] == 0 else jnp.roll(act, -shifts[t], axis=1)
            taps.append(jnp.where(masks[t], v, 0.0))
        patches = jnp.concatenate(taps, axis=0)                # (27*Cin, Mp)
        y = jnp.dot(w_ref[...], patches,
                    preferred_element_type=jnp.float32) + b_ref[...]
        return _lrelu(y)

    a1 = conv(a0, w1_ref, b1_ref)
    a2 = conv(a1, w2_ref, b2_ref)
    d2 = _lrelu(jnp.concatenate([a1, a2], axis=0))
    a3 = conv(d2, w3_ref, b3_ref)
    d3 = _lrelu(jnp.concatenate([a1, a2, a3], axis=0))
    a4 = conv(d3, w4_ref, b4_ref)
    d4 = _lrelu(jnp.concatenate([a1, a2, a3, a4], axis=0))
    a5 = conv(d4, w5_ref, b5_ref)
    d5 = _lrelu(jnp.concatenate([a1, a2, a3, a4, a5], axis=0))
    o_ref[0] = d5.astype(o_ref.dtype)


# ------------------------------ wrapper --------------------------------------

def dense_block_forward(x_ncdhw, params):
    # TODO(synk): BatchNorm running-stat updates (training side effect) are not modeled.
    N, Cin, D, H, W = x_ncdhw.shape
    F = params["b1"].shape[0]
    Mp = D * H * W

    x3 = x_ncdhw.reshape(N, Cin, Mp)          # NCDHW -> (N, C, M): free reshape

    # Pass 1: per-channel BN scale/shift over the whole batch (tiny kernel).
    x_cm = jnp.moveaxis(x3, 1, 0).reshape(Cin, N * Mp)
    scale, shift = pl.pallas_call(
        _bn_stats_kernel,
        out_shape=(jax.ShapeDtypeStruct((Cin, 1), jnp.float32),
                   jax.ShapeDtypeStruct((Cin, 1), jnp.float32)),
        grid=(1,),
        in_specs=[pl.BlockSpec((Cin, N * Mp), lambda i: (0, 0)),
                  pl.BlockSpec((Cin, 1), lambda i: (0, 0)),
                  pl.BlockSpec((Cin, 1), lambda i: (0, 0))],
        out_specs=(pl.BlockSpec((Cin, 1), lambda i: (0, 0)),
                   pl.BlockSpec((Cin, 1), lambda i: (0, 0))),
    )(x_cm, params["gamma"].reshape(Cin, 1), params["beta"].reshape(Cin, 1))

    # Pass 2: fully fused DenseBlock, one grid step per batch element.
    def wmat(w):   # DHWIO (3,3,3,Ci,Co) -> (Co, 27*Ci), tap-major / channel-minor
        return jnp.transpose(w, (4, 0, 1, 2, 3)).reshape(w.shape[-1], -1)

    wb_args, wb_specs = [], []
    for k in range(1, 6):
        wm = wmat(params[f"w{k}"])
        bm = params[f"b{k}"].reshape(F, 1)
        wb_args += [wm, bm]
        wb_specs += [pl.BlockSpec(wm.shape, lambda i: (0, 0)),
                     pl.BlockSpec(bm.shape, lambda i: (0, 0))]

    kernel = functools.partial(_dense_block_kernel, D=D, H=H, W=W)
    out = pl.pallas_call(
        kernel,
        out_shape=jax.ShapeDtypeStruct((N, 5 * F, Mp), x_ncdhw.dtype),
        grid=(N,),
        in_specs=[pl.BlockSpec((1, Cin, Mp), lambda i: (i, 0, 0)),
                  pl.BlockSpec((Cin, 1), lambda i: (0, 0)),
                  pl.BlockSpec((Cin, 1), lambda i: (0, 0))] + wb_specs,
        out_specs=pl.BlockSpec((1, 5 * F, Mp), lambda i: (i, 0, 0)),
        compiler_params=pltpu.CompilerParams(
            dimension_semantics=("parallel",)),
    )(x3, scale, shift, *wb_args)

    return out.reshape(N, 5 * F, D, H, W)      # (N, 5F, M) is already NCDHW order


# ------------------------------ params ---------------------------------------

def init_params(key, in_channels, num_features):
    ks = jax.random.split(key, 10)
    F = num_features

    def w(k, cin, cout):
        # stored in DHWIO layout (== torch weight (O,I,kd,kh,kw) transposed)
        return jax.random.normal(k, (3, 3, 3, cin, cout), jnp.float32) * 0.1

    def bias(k, cout):
        return jax.random.normal(k, (cout,), jnp.float32) * 0.1

    return dict(
        gamma=jnp.ones((in_channels,), jnp.float32),
        beta=jnp.zeros((in_channels,), jnp.float32),
        w1=w(ks[0], in_channels, F), b1=bias(ks[1], F),
        w2=w(ks[2], F, F),           b2=bias(ks[3], F),
        w3=w(ks[4], 2 * F, F),       b3=bias(ks[5], F),
        w4=w(ks[6], 3 * F, F),       b4=bias(ks[7], F),
        w5=w(ks[8], 4 * F, F),       b5=bias(ks[9], F),
    )


# --------------------------- pure-JAX reference ------------------------------

def _ref_forward(x_ncdhw, params):
    x = jnp.transpose(x_ncdhw, (0, 2, 3, 4, 1))
    mean = jnp.mean(x, axis=(0, 1, 2, 3), keepdims=True)
    var = jnp.mean((x - mean) ** 2, axis=(0, 1, 2, 3), keepdims=True)
    bn = (x - mean) * jax.lax.rsqrt(var + BN_EPS) * params["gamma"] + params["beta"]

    def conv(v, w, b):
        y = jax.lax.conv_general_dilated(
            v, w, (1, 1, 1), "SAME",
            dimension_numbers=("NDHWC", "DHWIO", "NDHWC"))
        return _lrelu(y + b)

    c1 = conv(bn, params["w1"], params["b1"])
    c2 = conv(c1, params["w2"], params["b2"])
    d2 = _lrelu(jnp.concatenate([c1, c2], -1))
    c3 = conv(d2, params["w3"], params["b3"])
    d3 = _lrelu(jnp.concatenate([c1, c2, c3], -1))
    c4 = conv(d3, params["w4"], params["b4"])
    d4 = _lrelu(jnp.concatenate([c1, c2, c3, c4], -1))
    c5 = conv(d4, params["w5"], params["b5"])
    d5 = _lrelu(jnp.concatenate([c1, c2, c3, c4, c5], -1))
    return jnp.transpose(d5, (0, 4, 1, 2, 3))


if __name__ == "__main__":
    key = jax.random.PRNGKey(0)
    kx, kp = jax.random.split(key)
    in_channels, num_features = 3, 4
    N, D, H, W = 2, 8, 8, 8
    x = jax.random.normal(kx, (N, in_channels, D, H, W), jnp.float32)
    params = init_params(kp, in_channels, num_features)

    out = jax.block_until_ready(dense_block_forward(x, params))
    assert out.shape == (N, 5 * num_features, D, H, W), out.shape

    ref = jax.block_until_ready(_ref_forward(x, params))
    err = float(jnp.max(jnp.abs(out - ref)))
    scale = float(jnp.max(jnp.abs(ref))) + 1e-6
    assert err / scale < 1e-2, f"mismatch: abs err {err}, scale {scale}"

    print("KERNEL_OK")
</pallas_src>

<mosaic_0001>
module attributes {stable_mosaic.version = 11 : i64} {
  func.func @_bn_stats_kernel(%arg0: i32, %arg1: memref<3x1024xf32, #tpu.memory_space<vmem>>, %arg2: memref<3x1xf32, #tpu.memory_space<vmem>>, %arg3: memref<3x1xf32, #tpu.memory_space<vmem>>, %arg4: memref<3x1xf32, #tpu.memory_space<vmem>>, %arg5: memref<3x1xf32, #tpu.memory_space<vmem>>) attributes {dimension_semantics = [#tpu.dimension_semantics<arbitrary>], iteration_bounds = array<i64: 1>, scalar_prefetch = 0 : i64, scratch_operands = 0 : i64, tpu.core_type = #tpu.core_type<tc>, window_params = [{pipeline_mode = #tpu.pipeline_mode<synchronous>, transform_indices = @transform_0, window_bounds = array<i64: 3, 1024>}, {pipeline_mode = #tpu.pipeline_mode<synchronous>, transform_indices = @transform_1, window_bounds = array<i64: 3, 1>}, {pipeline_mode = #tpu.pipeline_mode<synchronous>, transform_indices = @transform_2, window_bounds = array<i64: 3, 1>}, {pipeline_mode = #tpu.pipeline_mode<synchronous>, transform_indices = @transform_3, window_bounds = array<i64: 3, 1>}, {pipeline_mode = #tpu.pipeline_mode<synchronous>, transform_indices = @transform_4, window_bounds = array<i64: 3, 1>}]} {
    %c0 = arith.constant 0 : index
    %c0_0 = arith.constant 0 : index
    %0 = vector.load %arg1[%c0, %c0_0] : memref<3x1024xf32, #tpu.memory_space<vmem>>, vector<3x1024xf32>
    %cst = arith.constant dense<0.000000e+00> : vector<3xf32>
    %1 = vector.multi_reduction <add>, %0, %cst [1] : vector<3x1024xf32> to vector<3xf32>
    %2 = vector.shape_cast %1 : vector<3xf32> to vector<3x1xf32>
    %cst_1 = arith.constant 1.024000e+03 : f32
    %3 = vector.broadcast %cst_1 : f32 to vector<3x1xf32>
    %4 = arith.divf %2, %3 : vector<3x1xf32>
    %5 = vector.broadcast %4 : vector<3x1xf32> to vector<3x1024xf32>
    %6 = arith.subf %0, %5 : vector<3x1024xf32>
    %7 = arith.mulf %6, %6 : vector<3x1024xf32>
    %cst_2 = arith.constant dense<0.000000e+00> : vector<3xf32>
    %8 = vector.multi_reduction <add>, %7, %cst_2 [1] : vector<3x1024xf32> to vector<3xf32>
    %9 = vector.shape_cast %8 : vector<3xf32> to vector<3x1xf32>
    %cst_3 = arith.constant 1.024000e+03 : f32
    %10 = vector.broadcast %cst_3 : f32 to vector<3x1xf32>
    %11 = arith.divf %9, %10 : vector<3x1xf32>
    %cst_4 = arith.constant 9.99999974E-6 : f32
    %12 = vector.broadcast %cst_4 : f32 to vector<3x1xf32>
    %13 = arith.addf %11, %12 : vector<3x1xf32>
    %14 = math.rsqrt %13 : vector<3x1xf32>
    %c0_5 = arith.constant 0 : index
    %c0_6 = arith.constant 0 : index
    %15 = vector.load %arg2[%c0_5, %c0_6] : memref<3x1xf32, #tpu.memory_space<vmem>>, vector<3x1xf32>
    %16 = arith.mulf %15, %14 : vector<3x1xf32>
    %c0_7 = arith.constant 0 : index
    %c0_8 = arith.constant 0 : index
    %17 = vector.load %arg4[%c0_7, %c0_8] : memref<3x1xf32, #tpu.memory_space<vmem>>, vector<3x1xf32>
    tpu.vector_store %arg4[%c0_7, %c0_8], %16 {strides = array<i32>} : memref<3x1xf32, #tpu.memory_space<vmem>>, vector<3x1xf32>,
    %c0_9 = arith.constant 0 : index
    %c0_10 = arith.constant 0 : index
    %18 = vector.load %arg3[%c0_9, %c0_10] : memref<3x1xf32, #tpu.memory_space<vmem>>, vector<3x1xf32>
    %19 = arith.mulf %4, %16 : vector<3x1xf32>
    %20 = arith.subf %18, %19 : vector<3x1xf32>
    %c0_11 = arith.constant 0 : index
    %c0_12 = arith.constant 0 : index
    %21 = vector.load %arg5[%c0_11, %c0_12] : memref<3x1xf32, #tpu.memory_space<vmem>>, vector<3x1xf32>
    tpu.vector_store %arg5[%c0_11, %c0_12], %20 {strides = array<i32>} : memref<3x1xf32, #tpu.memory_space<vmem>>, vector<3x1xf32>,
    return
  }
  func.func @transform_0(%arg0: i32) -> (i32, i32) {
    %c0_i32 = arith.constant 0 : i32
    %c0_i32_0 = arith.constant 0 : i32
    %c0_i32_1 = arith.constant 0 : i32
    return %c0_i32, %c0_i32_0 : i32, i32
  }
  func.func @transform_1(%arg0: i32) -> (i32, i32) {
    %c0_i32 = arith.constant 0 : i32
    %c0_i32_0 = arith.constant 0 : i32
    %c0_i32_1 = arith.constant 0 : i32
    return %c0_i32, %c0_i32_0 : i32, i32
  }
  func.func @transform_2(%arg0: i32) -> (i32, i32) {
    %c0_i32 = arith.constant 0 : i32
    %c0_i32_0 = arith.constant 0 : i32
    %c0_i32_1 = arith.constant 0 : i32
    return %c0_i32, %c0_i32_0 : i32, i32
  }
  func.func @transform_3(%arg0: i32) -> (i32, i32) {
    %c0_i32 = arith.constant 0 : i32
    %c0_i32_0 = arith.constant 0 : i32
    %c0_i32_1 = arith.constant 0 : i32
    return %c0_i32, %c0_i32_0 : i32, i32
  }
  func.func @transform_4(%arg0: i32) -> (i32, i32) {
    %c0_i32 = arith.constant 0 : i32
    %c0_i32_0 = arith.constant 0 : i32
    %c0_i32_1 = arith.constant 0 : i32
    return %c0_i32, %c0_i32_0 : i32, i32
  }
}

</mosaic_0001>

<bundles_post_ra>
// kernel: tpu_custom_call.1
= control target key start
LH: loop header
LB: loop body
LE: loop exit
PB: predicated region body
PF: predicated region fallthrough
CT: control target
= control target key end

     0   :  { %10 = vsyncpa [#allocation3], 0  ;;  %s160_s15 = smov [#allocation2]   ;;  %s218_s0 = inlined_call_operand.hbm [shape: f32[3,1024], index: 0, kind: input, shape index: {}]   ;;  %s219_s1 = inlined_call_operand.vmem [shape: f32[3,1], index: 1, kind: input, shape index: {}]   ;;  %s220_s2 = inlined_call_operand.vmem [shape: f32[3,1], index: 2, kind: input, shape index: {}]   ;;  %s221_s3 = inlined_call_operand.vmem [shape: f32[3,1], index: 3, kind: output, shape index: {0}]   ;;  %s222_s4 = inlined_call_operand.vmem [shape: f32[3,1], index: 4, kind: output, shape index: {1}]  }
   0x1   :  { %s17_s16 = sshll.u32 %s160_s15, 4  ;;  %s18_s16 = int_to_ptr.vmem [resolvable:$true] %s17_s16 }
   0x2   :  { %s146_s17 = scalar_lea.vmem %s18_s16, 512  ;;  %p151_p1 = scmp.lt.s32.totalorder %s18_s16, %s18_s16 }
   0x3   :  { %p147_p0 = scmp.ne.s32.totalorder %s18_s16, %s146_s17  ;;  %p152_p2 = scmp.lt.s32.totalorder %s146_s17, %s146_s17 }
   0x5   :  { %p153_p3 = por %p152_p2, %p151_p1 }
   0x7   :  { %p154_p4 = pnand %p153_p3, %p147_p0 }
   0x9   :  { %157 = shalt.err (!%p154_p4)
}
   0xa   :  { %20 = dma.hbm_to_vmem [thread:$0]  %s218_s0, 512, %s18_s16, [#allocation3]  }
   0xb   :  { %158 = dma.done.wait [#allocation3], 512  }
   0xc   :  { %159 = vsyncadd [#allocation3], 4294966784  ;;  %vm44_vm0 = vcmask 1042432   ;;  %v28_v0 = vld [vmem:[#allocation2] sm:$0x77]  ;;  %v68_v25 = vlaneseq  ;;  %vm115_vm1 = vcmask 2048  }
   0xd   :  { %v29_v1 = vld [vmem:[#allocation2 + $0x8] sm:$0x77]  ;;  %v36_v2 = vcombine.high %v28_v0, %v28_v0  ;;  %v45_v4 = vsel %vm44_vm0, %v28_v0, 0.0  ;;  %v30_v5 = vld [vmem:[#allocation2 + $0x10] sm:$0x77] }
   0xe   :  { %v37_v3 = vcombine.high %v29_v1, %v29_v1  ;;  %v48_v7 = vsel %vm44_vm0, %v29_v1, 0.0  ;;  %v38_v9 = vcombine.high %v30_v5, %v30_v5  ;;  %v31_v11 = vld [vmem:[#allocation2 + $0x18] sm:$0x77]  ;;  %v52_v13 = vsel %vm44_vm0, %v30_v5, 0.0  ;;  %v113_v62 = vld [vmem:[%s219_s1] sm:$0x7] }
   0xf   :  { %v46_v6 = vsel %vm44_vm0, %v36_v2, 0.0  ;;  %v39_v15 = vcombine.high %v31_v11, %v31_v11  ;;  %v56_v18 = vsel %vm44_vm0, %v31_v11, 0.0  ;;  %v161_v23 = vmov 839922192  }
  0x10   :  { %v47_v8 = vadd.f32 %v46_v6, %v45_v4  ;;  %v50_v10 = vsel %vm44_vm0, %v37_v3, 0.0  ;;  %v54_v16 = vsel %vm44_vm0, %v38_v9, 0.0  ;;  %v66_v24 = vunpack.c.l.s4 %v161_v23 }
  0x11   :  { %v58_v20 = vsel %vm44_vm0, %v39_v15, 0.0  ;;  %v69_v27 = vshrl.u32 %v68_v25, 7 }
  0x12   :  { %v49_v12 = vadd.f32 %v48_v7, %v47_v8  ;;  %v67_v26 = vunpack.c.0.s8 %v66_v24 }
  0x14   :  { %v51_v14 = vadd.f32 %v50_v10, %v49_v12  ;;  %v70_v28 = vsub.s32 %v67_v26, %v69_v27 }
  0x16   :  { %v53_v17 = vadd.f32 %v52_v13, %v51_v14 }
  0x18   :  { %v55_v19 = vadd.f32 %v54_v16, %v53_v17 }
  0x1a   :  { %v57_v21 = vadd.f32 %v56_v18, %v55_v19 }
  0x1c   :  { %v59_v22 = vadd.f32 %v58_v20, %v57_v21 }
  0x1e   :  { %60 = vadd.xlane.f32.xlu0 %v59_v22 }
  0xa7   :  { %v61_v29 = vpop.xlane.xlu0 %60 }
  0xa8   :  { %v63_v30 = vmul.f32 0.0009765625, %v61_v29 }
  0xaa   :  { %v71_v31 = vrot.slane %v63_v30, %v70_v28 }
  0xac   :  { %v73_v32 = vsub.f32 %v28_v0, %v71_v31  ;;  %v74_v33 = vsub.f32 %v29_v1, %v71_v31  ;;  %v75_v34 = vsub.f32 %v30_v5, %v71_v31  ;;  %v76_v38 = vsub.f32 %v31_v11, %v71_v31  ;;  %v117_v1 = vld [vmem:[%s220_s2] sm:$0x7] }
  0xae   :  { %v77_v35 = vmul.f32 %v73_v32, %v73_v32  ;;  %v78_v36 = vmul.f32 %v74_v33, %v74_v33  ;;  %v79_v40 = vmul.f32 %v75_v34, %v75_v34  ;;  %v80_v46 = vmul.f32 %v76_v38, %v76_v38 }
  0xb0   :  { %v85_v37 = vcombine.high %v77_v35, %v77_v35  ;;  %v93_v39 = vsel %vm44_vm0, %v77_v35, 0.0  ;;  %v86_v41 = vcombine.high %v78_v36, %v78_v36  ;;  %v96_v44 = vsel %vm44_vm0, %v78_v36, 0.0 }
  0xb1   :  { %v87_v47 = vcombine.high %v79_v40, %v79_v40  ;;  %v100_v50 = vsel %vm44_vm0, %v79_v40, 0.0  ;;  %v88_v52 = vcombine.high %v80_v46, %v80_v46  ;;  %v104_v55 = vsel %vm44_vm0, %v80_v46, 0.0 }
  0xb2   :  { %v94_v42 = vsel %vm44_vm0, %v85_v37, 0.0  ;;  %v98_v48 = vsel %vm44_vm0, %v86_v41, 0.0 }
  0xb3   :  { %v95_v43 = vadd.f32 %v94_v42, %v93_v39  ;;  %v102_v53 = vsel %vm44_vm0, %v87_v47, 0.0  ;;  %v106_v57 = vsel %vm44_vm0, %v88_v52, 0.0 }
  0xb5   :  { %v97_v45 = vadd.f32 %v96_v44, %v95_v43 }
  0xb7   :  { %v99_v49 = vadd.f32 %v98_v48, %v97_v45 }
  0xb9   :  { %v101_v51 = vadd.f32 %v100_v50, %v99_v49 }
  0xbb   :  { %v103_v54 = vadd.f32 %v102_v53, %v101_v51 }
  0xbd   :  { %v105_v56 = vadd.f32 %v104_v55, %v103_v54 }
  0xbf   :  { %v107_v58 = vadd.f32 %v106_v57, %v105_v56 }
  0xc1   :  { %108 = vadd.xlane.f32.xlu0 %v107_v58 }
 0x14a   :  { %v109_v59 = vpop.xlane.xlu0 %108 }
 0x14b   :  { %v110_v60 = vmul.f32 0.0009765625, %v109_v59 }
 0x14d   :  { %v111_v61 = vadd.f32 1e-05, %v110_v60 }
 0x14f   :  { %136 = vrsqrt.f32 %v111_v61 }
 0x15c   :  { %v137_v63 = vpop.eup %136 }
 0x15d   :  { %v114_v0 = vmul.f32 %v137_v63, %v113_v62 }
 0x15f   :  { %116 = vst.msk [vmem:[%s221_s3] sm:$0x7] %vm115_vm1, %v114_v0  ;;  %v118_v2 = vmul.f32 %v114_v0, %v63_v30 }
 0x161   :  { %v119_v3 = vsub.f32 %v117_v1, %v118_v2 }
 0x163   :  { %120 = vst.msk [vmem:[%s222_s4] sm:$0x7] %vm115_vm1, %v119_v3 }
 0x164   :  { %129 = vsyncpa [#allocation3], 1 }

</bundles_post_ra>
